<compile_context>
chip_gen: v7x
topology: tpu7x:2x2x1
jax: 0.10.0
libtpu: 0.0.40
codegen_flags: <defaults>
</compile_context>

<pallas_src>
import jax
import jax.numpy as jnp
from jax import lax
from jax.experimental import pallas as pl
from jax.experimental.pallas import tpu as pltpu


# ------------------------------- kernel ------------------------------------ #

def _gelu_erf(y):
    # exact erf-based GELU decomposition used by the PyTorch graph:
    #   v = (y * 0.5) * (erf(y * 0.7071067811865476) + 1)
    return (y * 0.5) * (lax.erf(y * 0.7071067811865476) + 1.0)


def _fused_kernel(xa_ref, wslab_ref, w43r_ref, o_ref):
    """Whole forward graph; all intermediates live in VMEM/vregs.

    xa_ref    : (C+1, P)        x (channels x pixels) + ones row (bias fold)
    wslab_ref : (C1+1+C2, C1+1) rows [0,C1)      = [w1 | b1]
                                row  C1          = [(w5+w6) | (b5+b6)]
                                rows [C1+1, end) = [w2 | b2]
    w43r_ref  : (C4, C+1, P)    conv4∘conv3 folded; bias in channel C, lane 0
    o_ref     : (C4+C2, P)      rows [0,C4) = v17, rows [C4,end) = v12
    """
    cp1, p = xa_ref.shape                 # C+1, P
    c4 = w43r_ref.shape[0]
    c1 = wslab_ref.shape[1] - 1           # slab width == C1+1
    c2 = o_ref.shape[0] - c4

    xa = xa_ref[...]                                        # (C+1, P)

    # --- stage A: conv1 (+bias) and conv5+conv6 (+bias) in ONE matmul ------- #
    wa = wslab_ref[0:c1 + 1, 0:cp1]                         # (C1+1, C+1)
    ya = jnp.dot(wa, xa, preferred_element_type=jnp.float32)
    v1 = ya[:c1, :]                                         # conv1 out  (C1, P)
    v56 = ya[c1:c1 + 1, :]                                  # v15 + v16  (1,  P)

    # --- stage B: erf-GELU -> conv2 -> erf-GELU (v1..v12) ------------------- #
    v6 = _gelu_erf(v1)
    w2 = wslab_ref[c1 + 1:c1 + 1 + c2, 0:c1]                # (C2, C1)
    b2 = wslab_ref[c1 + 1:c1 + 1 + c2, c1:c1 + 1]           # (C2, 1)
    v7 = jnp.dot(w2, v6, preferred_element_type=jnp.float32) + b2
    v12 = _gelu_erf(v7)                                     # (C2, P)

    # --- stage C: v14 = conv4(conv3(x)) folded -> VPU multiply + reduce ----- #
    prod = w43r_ref[...] * xa[None, :, :]                   # (C4, C+1, P)
    v14 = jnp.sum(jnp.sum(prod, axis=2, keepdims=True), axis=1)   # (C4, 1)

    # --- v17 = v14 + (v15+v16), stacked with v12 into the single output ----- #
    o_ref[0:c4, :] = v14 + v56                              # (C4, P)
    o_ref[c4:, :] = v12                                     # (C2, P)


# ------------------------------- wrapper ----------------------------------- #

def model_forward(x, params):
    """Reproduces Model.forward with mutually consistent small shapes."""
    (w1, b1), (w2, b2), (w3, b3), (w4, b4), (w5, b5), (w6, b6) = params
    N, C, H, W = x.shape
    assert N == 1
    # 3x3 / stride-2 / pad-1 output grid; the final broadcast add of the
    # original graph is only well defined when this grid is 1x1.
    Ho = (H + 2 - 3) // 2 + 1
    Wo = (W + 2 - 3) // 2 + 1
    assert Ho == 1 and Wo == 1, "v14 + v15 + v16 requires the stride-2 branch to be 1x1"
    P = H * W
    C1, C2, C3, C4 = w1.shape[0], w2.shape[0], w3.shape[0], w4.shape[0]
    hi = lax.Precision.HIGHEST

    # ---- activation: x as (channels, pixels) with a ones row (bias fold) --- #
    x_mat = x[0].reshape(C, P)
    xa = jnp.concatenate([x_mat, jnp.ones((1, P), x.dtype)], axis=0)   # (C+1, P)

    # ---- weight slab: [w1|b1 ; (w5+w6)|(b5+b6) ; w2|b2], one DMA window ---- #
    WD = C1 + 1
    blockA = jnp.zeros((C1 + 1, WD), jnp.float32)
    blockA = blockA.at[:C1, :C].set(w1).at[:C1, C].set(b1[:, 0])
    blockA = blockA.at[C1, :C].set((w5 + w6)[0]).at[C1, C].set((b5 + b6)[0, 0])
    blockB = jnp.concatenate([w2, b2], axis=1)                         # (C2, C1+1)
    wslab = jnp.concatenate([blockA, blockB], axis=0)                  # (C1+1+C2, C1+1)

    # ---- fold conv3 -> conv4 (exact linear algebra, once per call) --------- #
    # in-bounds taps of the 3x3/s2/p1 conv for the single (0,0) output pixel
    w3_eff = w3[:, :, 1:1 + H, 1:1 + W].reshape(C3, C * P)             # (C3, C*P)
    w43 = jnp.dot(w4, w3_eff, precision=hi)                            # (C4, C*P)
    b43 = jnp.dot(w4, b3, precision=hi) + b4                           # (C4, 1)
    w43r = jnp.zeros((C4, C + 1, P), jnp.float32)
    w43r = w43r.at[:, :C, :].set(w43.reshape(C4, C, P))
    w43r = w43r.at[:, C, 0].set(b43[:, 0])                 # bias via ones row, lane 0

    # ---- single fused pallas_call ------------------------------------------ #
    flops = 2 * ((C1 + 1) * (C + 1) * P + C2 * C1 * P + C4 * (C + 1) * P)
    bytes_accessed = 4 * (xa.size + wslab.size + w43r.size + (C4 + C2) * P)
    vmem = pl.BlockSpec(memory_space=pltpu.MemorySpace.VMEM)
    out = pl.pallas_call(
        _fused_kernel,
        in_specs=[vmem, vmem, vmem],
        out_specs=vmem,
        out_shape=jax.ShapeDtypeStruct((C4 + C2, P), jnp.float32),
        cost_estimate=pl.CostEstimate(flops=flops,
                                      transcendentals=(C1 + C2) * P,
                                      bytes_accessed=bytes_accessed),
    )(xa, wslab, w43r)

    v17 = out[:C4].reshape(1, C4, H, W)
    v12 = out[C4:].reshape(1, C2, H, W)
    return v17, v12


# ------------------------------- reference --------------------------------- #

def _reference_forward(x, params):
    """Pure-JAX reference (high precision) for correctness checking."""
    (w1, b1), (w2, b2), (w3, b3), (w4, b4), (w5, b5), (w6, b6) = params
    N, C, H, W = x.shape
    hi = lax.Precision.HIGHEST
    xm = x[0].reshape(C, H * W)
    g = _gelu_erf
    v6 = g(jnp.dot(w1, xm, precision=hi) + b1)
    v12 = g(jnp.dot(w2, v6, precision=hi) + b2)
    v13 = lax.conv_general_dilated(
        x, w3, window_strides=(2, 2), padding=((1, 1), (1, 1)),
        dimension_numbers=("NCHW", "OIHW", "NCHW"), precision=hi,
    ) + b3.reshape(1, -1, 1, 1)
    v13m = v13[0].reshape(w3.shape[0], -1)
    v14 = jnp.dot(w4, v13m, precision=hi) + b4
    v15 = jnp.dot(w5, xm, precision=hi) + b5
    v16 = jnp.dot(w6, xm, precision=hi) + b6
    v17 = v14 + v15 + v16
    return (v17.reshape(1, w4.shape[0], H, W),
            v12.reshape(1, w2.shape[0], H, W))


# --------------------------------- main ------------------------------------ #

if __name__ == "__main__":
    key = jax.random.PRNGKey(0)
    ks = jax.random.split(key, 14)

    # small, mutually consistent shapes (see header note).
    N, C, H, W = 1, 9, 2, 2
    C1, C2, C3, C4 = 32, 16, 24, 8

    x = jax.random.normal(ks[0], (N, C, H, W), jnp.float32)

    def mk(kw, kb, co, ci, kh=1, kww=1):
        scale = 1.0 / jnp.sqrt(jnp.float32(ci * kh * kww))
        if kh == 1 and kww == 1:
            w = jax.random.normal(kw, (co, ci), jnp.float32) * scale
        else:
            w = jax.random.normal(kw, (co, ci, kh, kww), jnp.float32) * scale
        b = jax.random.normal(kb, (co, 1), jnp.float32) * scale
        return w, b

    params = (
        mk(ks[1], ks[2], C1, C),              # conv1: 1x1
        mk(ks[3], ks[4], C2, C1),             # conv2: 1x1
        mk(ks[5], ks[6], C3, C, 3, 3),        # conv3: 3x3 stride 2 pad 1
        mk(ks[7], ks[8], C4, C3),             # conv4: 1x1
        mk(ks[9], ks[10], 1, C),              # conv5: 1x1
        mk(ks[11], ks[12], 1, C),             # conv6: 1x1
    )

    fwd = jax.jit(model_forward)
    out, v12 = fwd(x, params)
    jax.block_until_ready((out, v12))
    assert out.shape == (1, C4, H, W), out.shape
    assert v12.shape == (1, C2, H, W), v12.shape

    ref_out, ref_v12 = _reference_forward(x, params)
    assert bool(jnp.allclose(out, ref_out, atol=1e-3, rtol=1e-3)), "v17 mismatch"
    assert bool(jnp.allclose(v12, ref_v12, atol=1e-3, rtol=1e-3)), "v12 mismatch"

    print("KERNEL_OK")
</pallas_src>

<mosaic_0001>
module attributes {stable_mosaic.version = 11 : i64} {
  func.func @_fused_kernel(%arg0: memref<10x4xf32, #tpu.memory_space<vmem>>, %arg1: memref<49x33xf32, #tpu.memory_space<vmem>>, %arg2: memref<8x10x4xf32, #tpu.memory_space<vmem>>, %arg3: memref<24x4xf32, #tpu.memory_space<vmem>>) attributes {dimension_semantics = [], scalar_prefetch = 0 : i64, scratch_operands = 0 : i64, tpu.core_type = #tpu.core_type<tc>} {
    %c0 = arith.constant 0 : index
    %c0_0 = arith.constant 0 : index
    %0 = vector.load %arg0[%c0, %c0_0] : memref<10x4xf32, #tpu.memory_space<vmem>>, vector<10x4xf32>
    %c0_1 = arith.constant 0 : index
    %c0_2 = arith.constant 0 : index
    %1 = vector.load %arg1[%c0_1, %c0_2] : memref<49x33xf32, #tpu.memory_space<vmem>>, vector<33x10xf32>
    %cst = arith.constant dense<0.000000e+00> : vector<33x4xf32>
    %2 = tpu.matmul %1, %0, %cst {dimension_numbers = #tpu.dot_dimension_numbers<[1], [0], [0], [1], [0, 0, 1, 1], [], []>} : vector<33x10xf32>, vector<10x4xf32>, vector<33x4xf32> -> vector<33x4xf32>
    %3 = vector.extract_strided_slice %2 {offsets = [0, 0], sizes = [32, 4], strides = [1, 1]} : vector<33x4xf32> to vector<32x4xf32>
    %4 = vector.extract_strided_slice %2 {offsets = [32, 0], sizes = [1, 4], strides = [1, 1]} : vector<33x4xf32> to vector<1x4xf32>
    %cst_3 = arith.constant 5.000000e-01 : f32
    %5 = vector.broadcast %cst_3 : f32 to vector<32x4xf32>
    %6 = arith.mulf %3, %5 : vector<32x4xf32>
    %cst_4 = arith.constant 0.707106769 : f32
    %7 = vector.broadcast %cst_4 : f32 to vector<32x4xf32>
    %8 = arith.mulf %3, %7 : vector<32x4xf32>
    %9 = math.erf %8 : vector<32x4xf32>
    %cst_5 = arith.constant 1.000000e+00 : f32
    %10 = vector.broadcast %cst_5 : f32 to vector<32x4xf32>
    %11 = arith.addf %9, %10 : vector<32x4xf32>
    %12 = arith.mulf %6, %11 : vector<32x4xf32>
    %c33 = arith.constant 33 : index
    %c0_6 = arith.constant 0 : index
    %13 = vector.load %arg1[%c33, %c0_6] : memref<49x33xf32, #tpu.memory_space<vmem>>, vector<16x32xf32>
    %c33_7 = arith.constant 33 : index
    %c32 = arith.constant 32 : index
    %14 = vector.load %arg1[%c33_7, %c32] : memref<49x33xf32, #tpu.memory_space<vmem>>, vector<16x1xf32>
    %cst_8 = arith.constant dense<0.000000e+00> : vector<16x4xf32>
    %15 = tpu.matmul %13, %12, %cst_8 {dimension_numbers = #tpu.dot_dimension_numbers<[1], [0], [0], [1], [0, 0, 1, 1], [], []>} : vector<16x32xf32>, vector<32x4xf32>, vector<16x4xf32> -> vector<16x4xf32>
    %16 = vector.broadcast %14 : vector<16x1xf32> to vector<16x4xf32>
    %17 = arith.addf %15, %16 : vector<16x4xf32>
    %cst_9 = arith.constant 5.000000e-01 : f32
    %18 = vector.broadcast %cst_9 : f32 to vector<16x4xf32>
    %19 = arith.mulf %17, %18 : vector<16x4xf32>
    %cst_10 = arith.constant 0.707106769 : f32
    %20 = vector.broadcast %cst_10 : f32 to vector<16x4xf32>
    %21 = arith.mulf %17, %20 : vector<16x4xf32>
    %22 = math.erf %21 : vector<16x4xf32>
    %cst_11 = arith.constant 1.000000e+00 : f32
    %23 = vector.broadcast %cst_11 : f32 to vector<16x4xf32>
    %24 = arith.addf %22, %23 : vector<16x4xf32>
    %25 = arith.mulf %19, %24 : vector<16x4xf32>
    %c0_12 = arith.constant 0 : index
    %c0_13 = arith.constant 0 : index
    %c0_14 = arith.constant 0 : index
    %26 = vector.load %arg2[%c0_12, %c0_13, %c0_14] : memref<8x10x4xf32, #tpu.memory_space<vmem>>, vector<8x10x4xf32>
    %27 = vector.shape_cast %0 : vector<10x4xf32> to vector<1x10x4xf32>
    %28 = vector.broadcast %27 : vector<1x10x4xf32> to vector<8x10x4xf32>
    %29 = arith.mulf %26, %28 : vector<8x10x4xf32>
    %cst_15 = arith.constant dense<0.000000e+00> : vector<8x10xf32>
    %30 = vector.multi_reduction <add>, %29, %cst_15 [2] : vector<8x10x4xf32> to vector<8x10xf32>
    %31 = vector.shape_cast %30 : vector<8x10xf32> to vector<8x10x1xf32>
    %cst_16 = arith.constant dense<0.000000e+00> : vector<8x1xf32>
    %32 = vector.multi_reduction <add>, %31, %cst_16 [1] : vector<8x10x1xf32> to vector<8x1xf32>
    %33 = vector.broadcast %32 : vector<8x1xf32> to vector<8x4xf32>
    %34 = vector.broadcast %4 : vector<1x4xf32> to vector<8x4xf32>
    %35 = arith.addf %33, %34 : vector<8x4xf32>
    %c0_17 = arith.constant 0 : index
    %c0_18 = arith.constant 0 : index
    %36 = vector.load %arg3[%c0_17, %c0_18] : memref<24x4xf32, #tpu.memory_space<vmem>>, vector<8x4xf32>
    tpu.vector_store %arg3[%c0_17, %c0_18], %35 {strides = array<i32>} : memref<24x4xf32, #tpu.memory_space<vmem>>, vector<8x4xf32>,
    %c8 = arith.constant 8 : index
    %c0_19 = arith.constant 0 : index
    %37 = vector.load %arg3[%c8, %c0_19] : memref<24x4xf32, #tpu.memory_space<vmem>>, vector<16x4xf32>
    tpu.vector_store %arg3[%c8, %c0_19], %25 {strides = array<i32>} : memref<24x4xf32, #tpu.memory_space<vmem>>, vector<16x4xf32>,
    return
  }
}

</mosaic_0001>

<bundles_post_ra>
// kernel: model_forward.1
= control target key start
LH: loop header
LB: loop body
LE: loop exit
PB: predicated region body
PF: predicated region fallthrough
CT: control target
= control target key end

     0   :  { %vm37_vm0 = vcmask 1041408   ;;  %v532_v0 = vmov 0.0|0.0   ;;  %vm533_vm1 = vmmov 1   ;;  %vm534_vm3 = vmmov 0   ;;  %s697_s0 = inlined_call_operand.vmem [shape: f32[10,4], index: 0, kind: input, shape index: {}]   ;;  %s698_s1 = inlined_call_operand.vmem [shape: f32[49,33], index: 1, kind: input, shape index: {}]   ;;  %s699_s2 = inlined_call_operand.vmem [shape: f32[8,10,4], index: 2, kind: input, shape index: {}]   ;;  %s700_s3 = inlined_call_operand.vmem [shape: f32[24,4], index: 3, kind: output, shape index: {}]  }
   0x1   :  { %499 = vmatprep.subr.bf16.mxu0 %v532_v0  ;;  %511 = vmatprep.subr.bf16.mxu1 %v532_v0  ;;  %v560_v1 = vld [vmem:[%s697_s0] sm:$0xff]  ;;  %v565_v2 = vld [vmem:[%s697_s0 + $0x8] sm:$0x3]  ;;  %vm501_vm2 = vmpackc.low %vm37_vm0, %vm533_vm1  ;;  %v535_v4 = vmov 0.0   ;;  %vm21_vm4 = vcmask 80896   ;;  %vm163_vm5 = vcmask 261120  }
   0x2   :  { %v500_v3 = vpack.c.bf16 %v565_v2, %v560_v1  ;;  %473 = vmatprep.mubr.msk.f32.mxu0 %vm534_vm3, %v535_v4  ;;  %482 = vmatprep.mubr.msk.f32.mxu1 %vm534_vm3, %v535_v4  ;;  %v16_v5 = vld [vmem:[%s698_s1] sm:$0xff]  ;;  %v19_v6 = vld [vmem:[%s698_s1 + $0x18] sm:$0xff]  ;;  %v17_v7 = vld [vmem:[%s698_s1 + $0x8] sm:$0xff]  ;;  %vm289_vm6 = vcmask 25600   ;;  %v536_v14 = vmov 32   ;;  %vm285_vm7 = vcmask 31744  }
   0x3   :  { %v18_v8 = vld [vmem:[%s698_s1 + $0x10] sm:$0xff]  ;;  %v20_v9 = vld [vmem:[%s698_s1 + $0x20] sm:$0x1]  ;;  %v588_v10 = vld [vmem:[%s698_s1 + $0x21] sm:$0xff]  ;;  %519 = vset.pattern.permute.xlu1 %v536_v14  ;;  %518 = vset.pattern.permute.xlu0 %v536_v14  ;;  %vm420_vm8 = vcmask 1041409   ;;  %vm423_vm9 = vcmask 1042434  }
   0x4   :  { %502 = vmatpush3.bf16.msk.msra.mxu0 %vm501_vm2, %v500_v3  ;;  %512 = vmatpush3.bf16.msk.msra.mxu1 %vm501_vm2, %v500_v3  ;;  %v256_v11 = vld [vmem:[%s699_s2 + $0x18] sm:$0x3]  ;;  %v258_v12 = vld [vmem:[%s699_s2 + $0x28] sm:$0x3]  ;;  %v255_v13 = vld [vmem:[%s699_s2 + $0x10] sm:$0xff]  ;;  %vm426_vm10 = vcmask 1043459  }
   0x5   :  { %v272_v15 = vmul.f32 %v256_v11, %v565_v2  ;;  %v274_v16 = vmul.f32 %v258_v12, %v565_v2  ;;  %v271_v17 = vmul.f32 %v255_v13, %v560_v1  ;;  %v254_v18 = vld [vmem:[%s699_s2 + $0x8] sm:$0x3]  ;;  %v257_v20 = vld [vmem:[%s699_s2 + $0x20] sm:$0xff]  ;;  %v260_v21 = vld [vmem:[%s699_s2 + $0x38] sm:$0x3]  ;;  %vm429_vm11 = vcmask 1044484  }
   0x6   :  { %v270_v19 = vmul.f32 %v254_v18, %v565_v2  ;;  %v273_v26 = vmul.f32 %v257_v20, %v560_v1  ;;  %v276_v27 = vmul.f32 %v260_v21, %v565_v2  ;;  %v253_v28 = vld [vmem:[%s699_s2] sm:$0xff]  ;;  %v259_v29 = vld [vmem:[%s699_s2 + $0x30] sm:$0xff]  ;;  %v262_v34 = vld [vmem:[%s699_s2 + $0x48] sm:$0x3]  ;;  %vm432_vm12 = vcmask 1045509  }
   0x7   :  { %474 = vmatmul.mubr.msk.f32.vlgmr.msra.gmra.mrb[0].mxu0 %vm21_vm4, %v16_v5  ;;  %483 = vmatmul.mubr.msk.f32.vlgmr.msra.gmra.mrb[0].mxu1 %vm21_vm4, %v19_v6  ;;  %v296_v22 = vsel %vm289_vm6, %v272_v15, 0.0  ;;  %v302_v23 = vsel %vm289_vm6, %v274_v16, 0.0  ;;  %v293_v24 = vsel %vm285_vm7, %v271_v17, 0.0  ;;  %v269_v32 = vmul.f32 %v253_v28, %v560_v1  ;;  %v261_v35 = vld [vmem:[%s699_s2 + $0x40] sm:$0xff]  ;;  %v264_v40 = vld [vmem:[%s699_s2 + $0x58] sm:$0x3] }
   0x8   :  { %476 = vmatprep.mubr.msk.f32.mxu0 %vm534_vm3, %v535_v4  ;;  %485 = vmatprep.mubr.msk.f32.mxu1 %vm534_vm3, %v535_v4  ;;  %v290_v25 = vsel %vm289_vm6, %v270_v19, 0.0  ;;  %v299_v30 = vsel %vm285_vm7, %v273_v26, 0.0  ;;  %v308_v31 = vsel %vm289_vm6, %v276_v27, 0.0  ;;  %v275_v33 = vmul.f32 %v259_v29, %v560_v1  ;;  %v263_v41 = vld [vmem:[%s699_s2 + $0x50] sm:$0xff]  ;;  %v266_v46 = vld [vmem:[%s699_s2 + $0x68] sm:$0x3] }
   0x9   :  { %297 = vadd.xlane.f32.xlu0 %v296_v22  ;;  %303 = vadd.xlane.f32.xlu1 %v302_v23  ;;  %v286_v36 = vsel %vm285_vm7, %v269_v32, 0.0  ;;  %v278_v38 = vmul.f32 %v262_v34, %v565_v2  ;;  %v277_v39 = vmul.f32 %v261_v35, %v560_v1  ;;  %v280_v44 = vmul.f32 %v264_v40, %v565_v2  ;;  %v265_v47 = vld [vmem:[%s699_s2 + $0x60] sm:$0xff]  ;;  %v268_v52 = vld [vmem:[%s699_s2 + $0x78] sm:$0x3]  ;;  %v267_v53 = vld [vmem:[%s699_s2 + $0x70] sm:$0xff] }
   0xa   :  { %v305_v37 = vsel %vm285_vm7, %v275_v33, 0.0  ;;  %v279_v45 = vmul.f32 %v263_v41, %v560_v1  ;;  %v282_v50 = vmul.f32 %v266_v46, %v565_v2  ;;  %v281_v51 = vmul.f32 %v265_v47, %v560_v1  ;;  %v152_v60 = vld [vmem:[%s698_s1 + $0x29] sm:$0xff] }
   0xb   :  { %477 = vmatmul.mubr.msk.f32.gmra.mrb[2].mxu0 %vm21_vm4, %v17_v7  ;;  %486 = vmatmul.mubr.msk.f32.gmra.mrb[2].mxu1 %vm21_vm4, %v20_v9  ;;  %v314_v42 = vsel %vm289_vm6, %v278_v38, 0.0  ;;  %v311_v43 = vsel %vm285_vm7, %v277_v39, 0.0  ;;  %v320_v48 = vsel %vm289_vm6, %v280_v44, 0.0  ;;  %v284_v56 = vmul.f32 %v268_v52, %v565_v2 }
   0xc   :  { %479 = vmatprep.mubr.msk.f32.mxu0 %vm534_vm3, %v535_v4  ;;  %496 = vmatprep.mubr.msk.f32.mxu1 %vm163_vm5, %v588_v10  ;;  %v317_v49 = vsel %vm285_vm7, %v279_v45, 0.0  ;;  %v326_v54 = vsel %vm289_vm6, %v282_v50, 0.0  ;;  %v323_v55 = vsel %vm285_vm7, %v281_v51, 0.0  ;;  %v283_v57 = vmul.f32 %v267_v53, %v560_v1 }
   0xd   :  { %294 = vadd.xlane.f32.xlu0 %v293_v24  ;;  %291 = vadd.xlane.f32.xlu1 %v290_v25  ;;  %v332_v58 = vsel %vm289_vm6, %v284_v56, 0.0  ;;  %vm435_vm13 = vcmask 1046534   ;;  %vm438_vm14 = vcmask 1047559  }
   0xe   :  { %v329_v59 = vsel %vm285_vm7, %v283_v57, 0.0 }
   0xf   :  { %480 = vmatmul.mubr.msk.f32.gmra.mrb[4].mxu0 %vm21_vm4, %v18_v8 }
  0x11   :  { %300 = vadd.xlane.f32.xlu0 %v299_v30  ;;  %309 = vadd.xlane.f32.xlu1 %v308_v31 }
  0x15   :  { %287 = vadd.xlane.f32.xlu0 %v286_v36  ;;  %306 = vadd.xlane.f32.xlu1 %v305_v37 }
  0x19   :  { %315 = vadd.xlane.f32.xlu0 %v314_v42  ;;  %312 = vadd.xlane.f32.xlu1 %v311_v43 }
  0x1d   :  { %321 = vadd.xlane.f32.xlu0 %v320_v48  ;;  %318 = vadd.xlane.f32.xlu1 %v317_v49 }
  0x21   :  { %327 = vadd.xlane.f32.xlu0 %v326_v54  ;;  %324 = vadd.xlane.f32.xlu1 %v323_v55 }
  0x25   :  { %333 = vadd.xlane.f32.xlu0 %v332_v58  ;;  %330 = vadd.xlane.f32.xlu1 %v329_v59 }
  0x36   :  { %160 = vperm.xlu1 %519, %v152_v60  }
  0x3b   :  { %155 = vperm.xlu0 %518, %v588_v10  }
  0x96   :  { %v298_v27 = vpop.xlane.xlu0 %297  ;;  %v304_v28 = vpop.xlane.xlu1 %303 }
  0x97   :  { %v343_v33 = vsel %vm37_vm0, %v298_v27, 0.0  ;;  %v351_v35 = vsel %vm37_vm0, %v304_v28, 0.0 }
  0x9a   :  { %v295_v29 = vpop.xlane.xlu0 %294  ;;  %v292_v30 = vpop.xlane.xlu1 %291 }
  0x9b   :  { %v335_v34 = vsel %vm37_vm0, %v292_v30, 0.0  ;;  %v344_v36 = vadd.f32 %v343_v33, %v295_v29 }
  0x9d   :  { %v345_v43 = vrot.slane %v344_v36, 4 }
  0x9e   :  { %v301_v31 = vpop.xlane.xlu0 %300  ;;  %v310_v32 = vpop.xlane.xlu1 %309 }
  0x9f   :  { %v359_v37 = vsel %vm37_vm0, %v310_v32, 0.0  ;;  %v352_v41 = vadd.f32 %v351_v35, %v301_v31  ;;  %v346_v51 = vadd.f32 %v345_v43, %v344_v36 }
  0xa1   :  { %v353_v47 = vrot.slane %v352_v41, 4 }
  0xa2   :  { %v288_v38 = vpop.xlane.xlu0 %287  ;;  %v307_v39 = vpop.xlane.xlu1 %306 }
  0xa3   :  { %v336_v40 = vadd.f32 %v335_v34, %v288_v38  ;;  %v360_v42 = vadd.f32 %v359_v37, %v307_v39  ;;  %v354_v56 = vadd.f32 %v353_v47, %v352_v41 }
  0xa5   :  { %v337_v46 = vrot.slane %v336_v40, 4  ;;  %v361_v49 = vrot.slane %v360_v42, 4 }
  0xa6   :  { %v316_v44 = vpop.xlane.xlu0 %315  ;;  %v313_v45 = vpop.xlane.xlu1 %312 }
  0xa7   :  { %v367_v48 = vsel %vm37_vm0, %v316_v44, 0.0  ;;  %v338_v54 = vadd.f32 %v337_v46, %v336_v40  ;;  %v362_v58 = vadd.f32 %v361_v49, %v360_v42 }
  0xa8   :  { %v368_v50 = vadd.f32 %v367_v48, %v313_v45 }
  0xaa   :  { %v322_v52 = vpop.xlane.xlu0 %321  ;;  %v319_v53 = vpop.xlane.xlu1 %318  ;;  %v369_v55 = vrot.slane %v368_v50, 4 }
  0xab   :  { %v375_v57 = vsel %vm37_vm0, %v322_v52, 0.0 }
  0xac   :  { %v376_v59 = vadd.f32 %v375_v57, %v319_v53 }
  0xda   :  { %v107_v61 = vpop.f32.mrb[0].mxu0  ;;  %v122_v62 = vpop.f32.mrb[0].mxu1 }
  0xdb   :  { %v135_v63 = vmul.f32 0.70710677, %v107_v61  ;;  %v138_v0 = vmul.f32 0.70710677, %v122_v62  ;;  %v475_v1 = vpop.f32.mrb[1].mxu0  ;;  %v484_v2 = vpop.f32.mrb[1].mxu1 }
  0xdc   :  { %v131_v13 = vmul.f32 0.5, %v107_v61  ;;  %v134_v20 = vmul.f32 0.5, %v122_v62  ;;  %v370_v61 = vadd.f32 %v369_v55, %v368_v50  ;;  %v328_v62 = vpop.xlane.xlu0 %327  ;;  %v377_v1 = vrot.slane %v376_v59, 4 }
  0xdd   :  { %520 = verf.f32 %v135_v63  ;;  %v325_v63 = vpop.xlane.xlu1 %324  ;;  %v355_v2 = vrot.slane %v354_v56, 2 }
  0xde   :  { %v112_v3 = vpop.f32.mrb[2].mxu0  ;;  %522 = verf.f32 %v138_v0  ;;  %v339_v0 = vrot.slane %v338_v54, 2  ;;  %v127_v40 = vpop.f32.mrb[2].mxu1 }
  0xdf   :  { %v136_v4 = vmul.f32 0.70710677, %v112_v3  ;;  %v478_v5 = vpop.f32.mrb[3].mxu0  ;;  %v132_v14 = vmul.f32 0.5, %v112_v3  ;;  %v383_v3 = vsel %vm37_vm0, %v328_v62, 0.0  ;;  %v487_v43 = vpop.f32.mrb[3].mxu1 }
  0xe0   :  { %v378_v5 = vadd.f32 %v377_v1, %v376_v59 }
  0xe1   :  { %524 = verf.f32 %v136_v4  ;;  %v363_v4 = vrot.slane %v362_v58, 2 }
  0xe2   :  { %v117_v6 = vpop.f32.mrb[4].mxu0 }
  0xe3   :  { %v137_v7 = vmul.f32 0.70710677, %v117_v6  ;;  %v481_v8 = vpop.f32.mrb[5].mxu0  ;;  %v133_v21 = vmul.f32 0.5, %v117_v6  ;;  %v384_v6 = vadd.f32 %v383_v3, %v325_v63 }
  0xe5   :  { %526 = verf.f32 %v137_v7  ;;  %v399_v7 = vlaneseq }
  0xe7   :  { %v521_v9 = vpop.eup %520 }
  0xe8   :  { %v523_v11 = vpop.eup %522  ;;  %v143_v12 = vadd.f32 1.0, %v521_v9  ;;  %v371_v9 = vrot.slane %v370_v61, 2 }
  0xe9   :  { %v146_v17 = vadd.f32 1.0, %v523_v11  ;;  %v334_v11 = vpop.xlane.xlu0 %333 }
  0xea   :  { %v147_v16 = vmul.f32 %v143_v12, %v131_v13  ;;  %v331_v12 = vpop.xlane.xlu1 %330  ;;  %v379_v13 = vrot.slane %v378_v5, 2 }
  0xeb   :  { %v525_v10 = vpop.eup %524  ;;  %v150_v24 = vmul.f32 %v146_v17, %v134_v20  ;;  %v400_v20 = vshrl.u32 %v399_v7, 7 }
  0xec   :  { %v144_v15 = vadd.f32 1.0, %v525_v10  ;;  %v340_v10 = vadd.f32 %v339_v0, %v338_v54 }
  0xed   :  { %v401_v31 = vsub.s32 0, %v400_v20 }
  0xee   :  { %v148_v18 = vmul.f32 %v144_v15, %v132_v14  ;;  %v385_v14 = vrot.slane %v384_v6, 4  ;;  %v391_v15 = vsel %vm37_vm0, %v334_v11, 0.0  ;;  %v161_v7 = vpop.permute.xlu1 %160 }
  0xef   :  { %v527_v19 = vpop.eup %526  ;;  %v392_v17 = vadd.f32 %v391_v15, %v331_v12  ;;  %v402_v42 = vrot.slane %v127_v40, %v401_v31 }
  0xf0   :  { %v145_v22 = vadd.f32 1.0, %v527_v19  ;;  %v503_v23 = vpack.c.bf16 %v148_v18, %v147_v16  ;;  %v356_v16 = vadd.f32 %v355_v2, %v354_v56  ;;  %v364_v18 = vadd.f32 %v363_v4, %v362_v58 }
  0xf1   :  { %v386_v19 = vadd.f32 %v385_v14, %v384_v6 }
  0xf2   :  { %v149_v25 = vmul.f32 %v145_v22, %v133_v21  ;;  %504 = vmatprep.subr.bf16.mxu1 %v503_v23  ;;  %v372_v21 = vadd.f32 %v371_v9, %v370_v61  ;;  %v393_v22 = vrot.slane %v392_v17, 4  ;;  %v357_v27 = vrot.slane %v356_v16, 1 }
  0xf3   :  { %506 = vmatpush3.bf16.msra.mxu1 %v503_v23  ;;  %v365_v29 = vrot.slane %v364_v18, 1 }
  0xf4   :  { %v507_v26 = vpack.c.bf16 %v150_v24, %v149_v25  ;;  %v341_v24 = vrot.slane %v340_v10, 1  ;;  %v380_v25 = vadd.f32 %v379_v13, %v378_v5  ;;  %v394_v28 = vadd.f32 %v393_v22, %v392_v17 }
  0xf5   :  { %v373_v32 = vrot.slane %v372_v21, 1  ;;  %v358_v37 = vadd.f32 %v357_v27, %v356_v16  ;;  %v366_v41 = vadd.f32 %v365_v29, %v364_v18 }
  0xf6   :  { %508 = vmatprep.subr.bf16.mxu1 %v507_v26  ;;  %v395_v33 = vrot.slane %v394_v28, 2  ;;  %v342_v35 = vadd.f32 %v341_v24, %v340_v10  ;;  %v381_v36 = vrot.slane %v380_v25, 1 }
  0xf7   :  { %510 = vmatpush3.bf16.msra.mxu1 %v507_v26  ;;  %v387_v26 = vrot.slane %v386_v19, 2  ;;  %v374_v44 = vadd.f32 %v373_v32, %v372_v21  ;;  %v405_v50 = vadd.f32 %v402_v42, %v358_v37  ;;  %v406_v53 = vadd.f32 %v402_v42, %v366_v41 }
  0xf8   :  { %v396_v39 = vadd.f32 %v395_v33, %v394_v28  ;;  %v382_v46 = vadd.f32 %v381_v36, %v380_v25  ;;  %v403_v47 = vadd.f32 %v402_v42, %v342_v35 }
  0xf9   :  { %v388_v30 = vadd.f32 %v387_v26, %v386_v19  ;;  %v407_v54 = vadd.f32 %v402_v42, %v374_v44  ;;  %v422_v55 = vrot.slane %v405_v50, 6  ;;  %v425_v58 = vrot.slane %v406_v53, 5 }
  0xfa   :  { %497 = vmatmul.mubr.msk.f32.vlgmr.msra.gmra.mrb[4].mxu1 %vm163_vm5, %v152_v60  ;;  %v347_v60 = vrot.slane %v346_v51, 2  ;;  %v397_v45 = vrot.slane %v396_v39, 1  ;;  %v408_v56 = vadd.f32 %v402_v42, %v382_v46 }
  0xfb   :  { %v389_v38 = vrot.slane %v388_v30, 1  ;;  %v428_v61 = vrot.slane %v407_v54, 4 }
  0xfc   :  { %v348_v8 = vadd.f32 %v347_v60, %v346_v51  ;;  %v398_v51 = vadd.f32 %v397_v45, %v396_v39  ;;  %v431_v0 = vrot.slane %v408_v56, 3 }
  0xfd   :  { %v390_v49 = vadd.f32 %v389_v38, %v388_v30 }
  0xfe   :  { %v349_v23 = vrot.slane %v348_v8, 1  ;;  %v410_v62 = vadd.f32 %v402_v42, %v398_v51 }
  0xff   :  { %v409_v59 = vadd.f32 %v402_v42, %v390_v49 }
 0x100   :  { %v350_v34 = vadd.f32 %v349_v23, %v348_v8  ;;  %v437_v4 = vrot.slane %v410_v62, 1  ;;  %v156_v8 = vpop.permute.xlu0 %155 }
 0x101   :  { %v434_v2 = vrot.slane %v409_v59, 2 }
 0x102   :  { %v404_v48 = vadd.f32 %v402_v42, %v350_v34 }
 0x104   :  { %v419_v52 = vrot.slane %v404_v48, 7 }
 0x106   :  { %v421_v57 = vsel %vm420_vm8, %v419_v52, %v403_v47 }
 0x107   :  { %v424_v60 = vsel %vm423_vm9, %v422_v55, %v421_v57 }
 0x108   :  { %v427_v63 = vsel %vm426_vm10, %v425_v58, %v424_v60 }
 0x109   :  { %v430_v1 = vsel %vm429_vm11, %v428_v61, %v427_v63 }
 0x10a   :  { %v433_v3 = vsel %vm432_vm12, %v431_v0, %v430_v1 }
 0x10b   :  { %v436_v5 = vsel %vm435_vm13, %v434_v2, %v433_v3 }
 0x10c   :  { %v439_v6 = vsel %vm438_vm14, %v437_v4, %v436_v5 }
 0x10d   :  { %441 = vst.msk [vmem:[%s700_s3] sm:$0xff] %vm285_vm7, %v439_v6 }
 0x1cd   :  { %v498_v9 = vpop.f32.mrb[4].mxu1 }
 0x1ce   :  { %v240_v11 = vadd.f32 %v498_v9, %v161_v7  ;;  %v234_v12 = vpop.f32.mrb[5].mxu1 }
 0x1cf   :  { %v235_v10 = vadd.f32 %v234_v12, %v156_v8 }
 0x1d0   :  { %v246_v13 = vmul.f32 0.70710677, %v240_v11  ;;  %v244_v17 = vmul.f32 0.5, %v240_v11 }
 0x1d1   :  { %v245_v14 = vmul.f32 0.70710677, %v235_v10  ;;  %v243_v19 = vmul.f32 0.5, %v235_v10 }
 0x1d2   :  { %528 = verf.f32 %v246_v13 }
 0x1d3   :  { %530 = verf.f32 %v245_v14 }
 0x1dc   :  { %v529_v15 = vpop.eup %528 }
 0x1dd   :  { %v531_v16 = vpop.eup %530  ;;  %v250_v18 = vadd.f32 1.0, %v529_v15 }
 0x1de   :  { %v249_v20 = vadd.f32 1.0, %v531_v16 }
 0x1df   :  { %v252_v21 = vmul.f32 %v250_v18, %v244_v17 }
 0x1e0   :  { %v251_v22 = vmul.f32 %v249_v20, %v243_v19 }
 0x1e1   :  { %443 = vst.msk [vmem:[%s700_s3 + $0x10] sm:$0xff] %vm285_vm7, %v252_v21 }
 0x1e2   :  { %442 = vst.msk [vmem:[%s700_s3 + $0x8] sm:$0xff] %vm285_vm7, %v251_v22 }

</bundles_post_ra>
